<compile_context>
chip_gen: v6e
topology: v6e:2x2x1
jax: 0.10.0
libtpu: 0.0.40
codegen_flags: <defaults>
</compile_context>

<pallas_src>
import jax
import jax.numpy as jnp
from jax.experimental import pallas as pl
from jax.experimental.pallas import tpu as pltpu


# ---------------------------------------------------------------------------
# Primary path: one pallas_call for the whole pytree, HBM->HBM DMA per leaf.
# ---------------------------------------------------------------------------
def _make_multi_dma_identity_kernel(n):
    """Kernel copying n HBM-resident inputs to n HBM-resident outputs.

    All refs live in `pl.ANY` (no auto-DMA, no VMEM staging).  All n DMAs are
    started before any wait, so leaf copies overlap on the DMA engines.
    """

    def kernel(*refs):
        in_refs = refs[:n]
        out_refs = refs[n:2 * n]
        sem = refs[2 * n]
        copies = [
            pltpu.make_async_copy(in_refs[i], out_refs[i], sem.at[i])
            for i in range(n)
        ]
        for c in copies:
            c.start()
        for c in copies:
            c.wait()

    return kernel


def identity_neck(x):
    """Identity forward pass for a single array or any pytree of arrays.

    All non-empty leaves are passed through ONE pallas_call that performs a
    direct HBM->HBM async DMA per leaf (no VMEM, no grid, no per-leaf custom
    call dispatch).  Traffic is the minimum for a fresh output buffer:
    one HBM read + one HBM write per leaf.

    Call-site contract: if you do not need a fresh buffer, donate the input at
    the jit boundary (donate_argnums) and simply reuse `x`; any kernel-side
    "zero-copy" trick is otherwise undone by XLA's defensive copy.
    """
    leaves, treedef = jax.tree_util.tree_flatten(x)
    if not leaves:
        return x

    leaves = [jnp.asarray(leaf) for leaf in leaves]
    out_leaves = list(leaves)  # empty leaves pass through untouched

    nonempty = [i for i, leaf in enumerate(leaves) if leaf.size > 0]
    if nonempty:
        ins = [leaves[i] for i in nonempty]
        n = len(ins)
        outs = pl.pallas_call(
            _make_multi_dma_identity_kernel(n),
            out_shape=tuple(
                jax.ShapeDtypeStruct(a.shape, a.dtype) for a in ins
            ),
            in_specs=[pl.BlockSpec(memory_space=pl.ANY)] * n,
            out_specs=tuple(pl.BlockSpec(memory_space=pl.ANY) for _ in range(n)),
            scratch_shapes=[pltpu.SemaphoreType.DMA((n,))],
        )(*ins)
        for idx, o in zip(nonempty, jax.tree_util.tree_leaves(outs)):
            out_leaves[idx] = o

    return jax.tree_util.tree_unflatten(treedef, out_leaves)


# ---------------------------------------------------------------------------
# Secondary path: lane-dense tiled VMEM streaming copy (kept for callers that
# specifically want the pipelined-VMEM variant; otherwise use identity_neck).
# ---------------------------------------------------------------------------
def _copy_kernel(x_ref, o_ref):
    # Whole-tile load/store: pure copy on the VMEM load/store path.
    o_ref[...] = x_ref[...]


def identity_neck_vmem_copy(x, *, tile_bytes=8 * 1024 * 1024):
    """Identity via a lane-dense tiled HBM->VMEM->HBM streaming copy.

    The input is reshaped to a 2-D slab whose last dim is a multiple of 128
    (unmasked `vst` stores) and streamed in ~tile_bytes row tiles.  With
    Pallas double buffering input + output, live VMEM is ~4 * tile_bytes
    (= 32 MiB), kept under the explicit 48 MiB scoped-VMEM limit — safe on
    v5e/v6e (128 MiB physical) and v7x (64 MiB physical).  Shapes that cannot
    be reshaped lane-dense are routed through the DMA identity path to avoid
    masked partial stores.
    """
    x = jnp.asarray(x)
    orig_shape = x.shape
    dtype = x.dtype
    itemsize = jnp.dtype(dtype).itemsize
    total = int(x.size)

    if total == 0:
        return x

    # Largest multiple-of-128 width dividing the element count.
    cols = None
    for c in (16384, 8192, 4096, 2048, 1024, 512, 256, 128):
        if total % c == 0:
            cols = c
            break
    if cols is None:
        # Not lane-dense-reshapeable: avoid masked vst.msk partial stores by
        # using the shape-agnostic HBM->HBM DMA path instead.
        return identity_neck(x)

    rows = total // cols
    x2d = x.reshape(rows, cols)

    # Sublane-packing multiple for the dtype: 8 (4-byte), 16 (2-byte), 32 (1-byte).
    mult = max(8, 32 // max(1, itemsize))

    tile_rows = (tile_bytes // (cols * itemsize)) // mult * mult
    tile_rows = max(mult, tile_rows)
    if tile_rows >= rows:
        tile_rows = rows  # single full-extent block for small inputs
    grid = (pl.cdiv(rows, tile_rows),)  # ragged last block handled by Pallas

    out2d = pl.pallas_call(
        _copy_kernel,
        out_shape=jax.ShapeDtypeStruct((rows, cols), dtype),
        grid=grid,
        in_specs=[pl.BlockSpec((tile_rows, cols), lambda i: (i, 0))],
        out_specs=pl.BlockSpec((tile_rows, cols), lambda i: (i, 0)),
        compiler_params=pltpu.CompilerParams(
            # "parallel" lets v7x shard the row-tile grid across its 2 TCs.
            dimension_semantics=("parallel",),
            # Explicit limit: v5e's 16 MiB scoped default would otherwise be
            # tight; 48 MiB fits v7x's 64 MiB physical VMEM with headroom.
            vmem_limit_bytes=48 * 1024 * 1024,
        ),
    )(x2d)

    return out2d.reshape(orig_shape)


if __name__ == "__main__":
    # IdentityNeck has no parameters (init_weights is a no-op), so only inputs
    # need deterministic construction.
    key = jax.random.PRNGKey(0)
    x = jax.random.normal(key, (2, 4, 16, 16), dtype=jnp.float32)  # NCHW

    # Primary path: single array.
    y = jax.block_until_ready(identity_neck(x))
    assert y.shape == x.shape, (y.shape, x.shape)
    assert y.dtype == x.dtype, (y.dtype, x.dtype)
    assert bool(jnp.all(y == x)), "DMA identity output mismatch (single array)"

    # Primary path: FPN-style tuple of feature maps -> ONE batched pallas_call.
    k1, k2 = jax.random.split(key)
    feats = (
        jax.random.normal(k1, (2, 4, 16, 16), dtype=jnp.float32),
        jax.random.normal(k2, (2, 8, 8, 8), dtype=jnp.float32),
    )
    outs = jax.block_until_ready(identity_neck(feats))
    assert isinstance(outs, tuple) and len(outs) == len(feats)
    for o, f in zip(outs, feats):
        assert o.shape == f.shape and o.dtype == f.dtype
        assert bool(jnp.all(o == f)), "DMA identity output mismatch (pytree leaf)"

    # Secondary path: lane-dense VMEM streaming copy.
    y2 = jax.block_until_ready(identity_neck_vmem_copy(x))
    assert y2.shape == x.shape and y2.dtype == x.dtype
    assert bool(jnp.all(y2 == x)), "VMEM streaming-copy identity output mismatch"

    print("KERNEL_OK")
</pallas_src>

<mosaic_0001>
module attributes {stable_mosaic.version = 11 : i64} {
  func.func @kernel(%arg0: memref<2x4x16x16xf32, #tpu.memory_space<any>>, %arg1: memref<2x4x16x16xf32, #tpu.memory_space<any>>, %arg2: memref<1x!tpu.dma_semaphore, #tpu.memory_space<semaphore_mem>>) attributes {dimension_semantics = [], scalar_prefetch = 0 : i64, scratch_operands = 1 : i64, tpu.core_type = #tpu.core_type<tc>} {
    %c0_i32 = arith.constant 0 : i32
    %0 = tpu.memref_slice %arg2[%c0_i32] : memref<1x!tpu.dma_semaphore, #tpu.memory_space<semaphore_mem>> -> memref<1x!tpu.dma_semaphore, #tpu.memory_space<semaphore_mem>>
    %1 = tpu.memref_squeeze %0 : memref<1x!tpu.dma_semaphore, #tpu.memory_space<semaphore_mem>> -> memref<!tpu.dma_semaphore, #tpu.memory_space<semaphore_mem>>
    tpu.enqueue_dma source(%arg0 : memref<2x4x16x16xf32, #tpu.memory_space<any>>) target(%arg1 : memref<2x4x16x16xf32, #tpu.memory_space<any>>) target_semaphore(%1 : memref<!tpu.dma_semaphore, #tpu.memory_space<semaphore_mem>>)
    %c0_i32_0 = arith.constant 0 : i32
    %2 = tpu.memref_slice %arg2[%c0_i32_0] : memref<1x!tpu.dma_semaphore, #tpu.memory_space<semaphore_mem>> -> memref<1x!tpu.dma_semaphore, #tpu.memory_space<semaphore_mem>>
    %3 = tpu.memref_squeeze %2 : memref<1x!tpu.dma_semaphore, #tpu.memory_space<semaphore_mem>> -> memref<!tpu.dma_semaphore, #tpu.memory_space<semaphore_mem>>
    tpu.wait_dma2 semaphore(%3 : memref<!tpu.dma_semaphore, #tpu.memory_space<semaphore_mem>>) src(%arg0 : memref<2x4x16x16xf32, #tpu.memory_space<any>>) dst(%arg1 : memref<2x4x16x16xf32, #tpu.memory_space<any>>)
    return
  }
}

</mosaic_0001>

<bundles_post_ra>
// kernel: tpu_custom_call.1
= control target key start
LH: loop header
LB: loop body
LE: loop exit
PB: predicated region body
PF: predicated region fallthrough
CT: control target
= control target key end

     0   :  { %s30_s6 = smov [#allocation2]   ;;  %s31_s7 = smov 131072   ;;  %s49_s0 = inlined_call_operand.hbm [shape: f32[2,4,16,16], index: 0, kind: input, shape index: {}]   ;;  %s50_s1 = inlined_call_operand.hbm [shape: f32[2,4,16,16], index: 1, kind: output, shape index: {}]  }
   0x1   :  { %s32_s8 = smov 0  }
   0x2   :  { %12 = dma.general %s49_s0, 2048, %s50_s1, %s30_s6, %s31_s7, [#allocation4], %s32_s8, 0  }
   0x3   :  { %28 = dma.done.wait [#allocation2], 2048 }
   0x4   :  { %29 = vsyncadd [#allocation2], 4294965248 }
   0x5   :  { %18 = vsyncmov [#allocation2] }
   0x8   :  { %s19_s13 = vpop.sfrf %18 }
   0x9   :  { %p24_p0 = scmp.ne.s32.totalorder %s19_s13, 0 }
   0xb   :  { %23 = shalt.err (%p24_p0)  }

</bundles_post_ra>
